<compile_context>
chip_gen: v5e
topology: v5e:2x2
jax: 0.10.0
libtpu: 0.0.40
codegen_flags: <defaults>
</compile_context>

<pallas_src>
import functools

import jax
import jax.numpy as jnp
from jax.experimental import pallas as pl
from jax.experimental.pallas import tpu as pltpu


def _conv1x1_kernel(x_ref, w_ref, b_ref, o_ref):
    # x_ref: (Cin, THW), w_ref: (Cout, Cin), b_ref: (Cout, 1), o_ref: (Cout, THW)
    acc = jnp.dot(w_ref[...], x_ref[...], preferred_element_type=jnp.float32)
    acc = acc + b_ref[...].astype(jnp.float32)
    o_ref[...] = acc.astype(o_ref.dtype)


def _working_set_bytes(tile_hw, cin, cout, itemsize):
    # x and out blocks are double-buffered by the pipeline; weight + bias are
    # tiny but also double-buffered.
    return (2 * tile_hw * (cin + cout) + 2 * (cin * cout + cout)) * itemsize


def _choose_tile_hw(hw, cin, cout, itemsize, max_tile_hw, vmem_budget_bytes):
    """Largest lane tile (multiple of 128, capped) that fits the VMEM budget."""
    if hw <= 128:
        return hw  # single full-dim block; always a legal block shape
    if hw <= max_tile_hw and _working_set_bytes(hw, cin, cout, itemsize) <= vmem_budget_bytes:
        return hw  # single full block along HW, no ragged tail
    tile = (min(hw, max_tile_hw) // 128) * 128
    while tile > 128 and _working_set_bytes(tile, cin, cout, itemsize) > vmem_budget_bytes:
        tile -= 128
    return max(tile, 128)


@functools.partial(jax.jit, static_argnames=("max_tile_hw", "vmem_budget_bytes"))
def channel_reduction_1x1(x_nchw, weight, bias, *, max_tile_hw=2048,
                          vmem_budget_bytes=48 * 1024 * 1024):
    """1x1 Conv2d forward.

    x_nchw: (N, Cin, H, W)
    weight: (Cout, Cin, 1, 1)   (PyTorch Conv2d weight layout)
    bias:   (Cout,)
    returns (N, Cout, H, W)
    """
    N, Cin, H, W = x_nchw.shape
    Cout = weight.shape[0]
    HW = H * W
    itemsize = jnp.dtype(x_nchw.dtype).itemsize

    # TODO(synk): add K (Cin) / Cout tiling with an f32 VMEM accumulator for very
    # large channel counts whose full (Cin, Cout) weight no longer fits one block.
    tile_hw = _choose_tile_hw(HW, Cin, Cout, itemsize, max_tile_hw, vmem_budget_bytes)
    grid = (N, pl.cdiv(HW, tile_hw))

    x3 = x_nchw.reshape(N, Cin, HW)      # contiguous, metadata-only reshape
    w_mat = weight.reshape(Cout, Cin)
    b_col = bias.reshape(Cout, 1)

    cost = pl.CostEstimate(
        flops=2 * N * HW * Cin * Cout,
        transcendentals=0,
        bytes_accessed=itemsize * (N * HW * (Cin + Cout) + Cin * Cout + Cout),
    )

    need = _working_set_bytes(tile_hw, Cin, Cout, itemsize)
    # Headroom for compiler scratch; stay well under v7x's 64 MiB physical VMEM.
    vmem_limit = int(min(max(need + (2 << 20), 16 * 1024 * 1024), 56 * 1024 * 1024))

    out3 = pl.pallas_call(
        _conv1x1_kernel,
        out_shape=jax.ShapeDtypeStruct((N, Cout, HW), x_nchw.dtype),
        grid_spec=pltpu.PrefetchScalarGridSpec(
            num_scalar_prefetch=0,
            grid=grid,
            in_specs=[
                pl.BlockSpec((None, Cin, tile_hw), lambda n, j: (n, 0, j)),
                pl.BlockSpec((Cout, Cin), lambda n, j: (0, 0)),
                pl.BlockSpec((Cout, 1), lambda n, j: (0, 0)),
            ],
            out_specs=pl.BlockSpec((None, Cout, tile_hw), lambda n, j: (n, 0, j)),
        ),
        compiler_params=pltpu.CompilerParams(
            dimension_semantics=("parallel", "parallel"),
            vmem_limit_bytes=vmem_limit,
        ),
        cost_estimate=cost,
    )(x3, w_mat, b_col)

    return out3.reshape(N, Cout, H, W)


def init_params(key, in_ch, out_ch, dtype=jnp.float32):
    """Deterministic init matching nn.Conv2d defaults (uniform(-sqrt(k), sqrt(k)),
    k = 1 / (in_ch * 1 * 1))."""
    kw, kb = jax.random.split(key)
    k = 1.0 / in_ch
    bound = jnp.sqrt(k)
    weight = jax.random.uniform(
        kw, (out_ch, in_ch, 1, 1), dtype, minval=-bound, maxval=bound
    )
    bias = jax.random.uniform(kb, (out_ch,), dtype, minval=-bound, maxval=bound)
    return weight, bias


if __name__ == "__main__":
    key = jax.random.PRNGKey(0)
    k_x, k_p = jax.random.split(key)

    N, Cin, H, W = 2, 4, 16, 16
    Cout = 8

    x = jax.random.normal(k_x, (N, Cin, H, W), dtype=jnp.float32)
    weight, bias = init_params(k_p, Cin, Cout)

    out = channel_reduction_1x1(x, weight, bias)
    out = jax.block_until_ready(out)

    # Reference check (plain JAX einsum for the 1x1 conv).
    ref = (
        jnp.einsum("nchw,oc->nohw", x, weight.reshape(Cout, Cin))
        + bias[None, :, None, None]
    )
    assert out.shape == (N, Cout, H, W)
    assert jnp.allclose(out, ref, atol=1e-5, rtol=1e-5)

    print("KERNEL_OK")
</pallas_src>

<mosaic_0001>
module attributes {stable_mosaic.version = 11 : i64} {
  func.func @_conv1x1_kernel(%arg0: i32, %arg1: i32, %arg2: memref<1x4x256xf32, #tpu.memory_space<vmem>>, %arg3: memref<8x4xf32, #tpu.memory_space<vmem>>, %arg4: memref<8x1xf32, #tpu.memory_space<vmem>>, %arg5: memref<1x8x256xf32, #tpu.memory_space<vmem>>) attributes {dimension_semantics = [#tpu.dimension_semantics<parallel>, #tpu.dimension_semantics<parallel>], iteration_bounds = array<i64: 2, 1>, scalar_prefetch = 0 : i64, scratch_operands = 0 : i64, tpu.core_type = #tpu.core_type<tc>, window_params = [{transform_indices = @transform_0, window_bounds = array<i64: 1, 4, 256>}, {pipeline_mode = #tpu.pipeline_mode<synchronous>, transform_indices = @transform_1, window_bounds = array<i64: 8, 4>}, {pipeline_mode = #tpu.pipeline_mode<synchronous>, transform_indices = @transform_2, window_bounds = array<i64: 8, 1>}, {transform_indices = @transform_3, window_bounds = array<i64: 1, 8, 256>}]} {
    %c0 = arith.constant 0 : index
    %c0_0 = arith.constant 0 : index
    %0 = vector.load %arg3[%c0, %c0_0] : memref<8x4xf32, #tpu.memory_space<vmem>>, vector<8x4xf32>
    %c0_1 = arith.constant 0 : index
    %c0_2 = arith.constant 0 : index
    %c0_3 = arith.constant 0 : index
    %1 = vector.load %arg2[%c0_1, %c0_2, %c0_3] : memref<1x4x256xf32, #tpu.memory_space<vmem>>, vector<1x4x256xf32>
    %2 = vector.shape_cast %1 : vector<1x4x256xf32> to vector<4x256xf32>
    %cst = arith.constant dense<0.000000e+00> : vector<8x256xf32>
    %3 = tpu.matmul %0, %2, %cst {dimension_numbers = #tpu.dot_dimension_numbers<[1], [0], [0], [1], [0, 0, 1, 1], [], []>} : vector<8x4xf32>, vector<4x256xf32>, vector<8x256xf32> -> vector<8x256xf32>
    %c0_4 = arith.constant 0 : index
    %c0_5 = arith.constant 0 : index
    %4 = vector.load %arg4[%c0_4, %c0_5] : memref<8x1xf32, #tpu.memory_space<vmem>>, vector<8x1xf32>
    %5 = vector.broadcast %4 : vector<8x1xf32> to vector<8x256xf32>
    %6 = arith.addf %3, %5 : vector<8x256xf32>
    %c0_6 = arith.constant 0 : index
    %c0_7 = arith.constant 0 : index
    %c0_8 = arith.constant 0 : index
    %7 = vector.load %arg5[%c0_6, %c0_7, %c0_8] : memref<1x8x256xf32, #tpu.memory_space<vmem>>, vector<1x8x256xf32>
    %8 = vector.shape_cast %7 : vector<1x8x256xf32> to vector<8x256xf32>
    %9 = vector.shape_cast %6 : vector<8x256xf32> to vector<1x8x256xf32>
    tpu.vector_store %arg5[%c0_6, %c0_7, %c0_8], %9 {strides = array<i32>} : memref<1x8x256xf32, #tpu.memory_space<vmem>>, vector<1x8x256xf32>,
    return
  }
  func.func @transform_0(%arg0: i32, %arg1: i32) -> (i32, i32, i32) {
    %c0_i32 = arith.constant 0 : i32
    %c0_i32_0 = arith.constant 0 : i32
    return %arg0, %c0_i32, %arg1 : i32, i32, i32
  }
  func.func @transform_1(%arg0: i32, %arg1: i32) -> (i32, i32) {
    %c0_i32 = arith.constant 0 : i32
    %c0_i32_0 = arith.constant 0 : i32
    %c0_i32_1 = arith.constant 0 : i32
    return %c0_i32, %c0_i32_0 : i32, i32
  }
  func.func @transform_2(%arg0: i32, %arg1: i32) -> (i32, i32) {
    %c0_i32 = arith.constant 0 : i32
    %c0_i32_0 = arith.constant 0 : i32
    %c0_i32_1 = arith.constant 0 : i32
    return %c0_i32, %c0_i32_0 : i32, i32
  }
  func.func @transform_3(%arg0: i32, %arg1: i32) -> (i32, i32, i32) {
    %c0_i32 = arith.constant 0 : i32
    %c0_i32_0 = arith.constant 0 : i32
    return %arg0, %c0_i32, %arg1 : i32, i32, i32
  }
}

</mosaic_0001>

<bundles_post_ra>
// kernel: channel_reduction_1x1.1
= control target key start
LH: loop header
LB: loop body
LE: loop exit
PB: predicated region body
PF: predicated region fallthrough
CT: control target
= control target key end

     0   :  { %s448_s12 = smov 0   ;;  %s450_s13 = smov 0   ;;  %s487_s0 = inlined_call_operand.vmem [shape: f32[2,4,256], index: 0, kind: input, shape index: {}]   ;;  %s488_s1 = inlined_call_operand.vmem [shape: f32[8,4], index: 1, kind: input, shape index: {}]   ;;  %s489_s2 = inlined_call_operand.vmem [shape: f32[8,1], index: 2, kind: input, shape index: {}]   ;;  %s490_s3 = inlined_call_operand.vmem [shape: f32[2,8,256], index: 3, kind: output, shape index: {}]  }
   0x1   :  { %s452_s14 = smov 0  }
   0x2 LB: > { %s25_s15 = sadd.s32 1, %s421_s13  ;;  %p364_p0 = scmp.ge.s32.totalorder %s425_s14, 1  ;;  %s425_s14 = sphi %s452_s14, %s13_s14   ;;  %s421_s13 = sphi %s450_s13, %s492_s13   ;;  %s417_s12 = sphi %s448_s12, %s491_s12  }
   0x3   : > { %p27_p1 = scmp.ge.s32.totalorder %s25_s15, 2  ;;  %p158_p2 = scmp.lt.s32.totalorder %s425_s14, 3 }
   0x5   : > { %s494_s15 = smov (%p27_p1, %s25_s15), 0  ;;  %p159_p3 = pnand %p364_p0, %p158_p2 }
   0x6   : > { %p191_p4 = scmp.lt.s32.totalorder (!%p159_p3), %s417_s12, 1 }
   0x7   : > { %162 = sbr.rel (%p159_p3) target bundleno = 155 (0x9b), region = 32 }
   0xc   : > { %v212_v0 = vld [vmem:[%s489_s2] sm:$0xff]  ;;  %v427_v1 = vmov 0   ;;  %s496_s12 = smov (!%p191_p4, %s417_s12), 1  ;;  %vm226_vm0 = vcmask 1043456   ;;  %vm222_vm1 = vcmask 31744  }
   0xd   : > { %402 = vset.pattern.permute.xlu0 %v427_v1  ;;  %s375_s18 = sshll.u32 %s496_s12, 3  ;;  %v210_v3 = vld [vmem:[%s488_s1] sm:$0xff]  ;;  %s376_s24 = sshll.u32 %s496_s12, 4 }
   0xe   : > { %215 = vperm.xlu0 %402, %v212_v0   ;;  %s198_s21 = scalar_lea.vmem %s487_s0, %s375_s18  ;;  %s208_s27 = scalar_lea.vmem %s490_s3, %s376_s24 }
   0xf   : > { %v211_v2 = vld [vmem:[%s198_s21] sm:$0xff] }
  0x10   : > { %219 = vst [vmem:[#allocation1] ss:$2 sm:$0xff] %v211_v2 }
  0x17   : > { %v220_v4 = vld.sshfl [vmem:[#allocation1] sm:$0xff pattern:$0x75316420]  ;;  %v221_v5 = vld.sshfl [vmem:[#allocation1 + $0x8] sm:$0xff pattern:$0x75316420] }
  0x18   : > { %369 = vmatpush.msk.msra.mxu0 %vm226_vm0, %v220_v4  ;;  %371 = vmatpush.msk.msra.mxu1 %vm226_vm0, %v221_v5 }
  0x19   : > { %370 = vmatmul.msk.f32.vlgmr.msra.gmra.mxu0 %vm222_vm1, %v210_v3  ;;  %372 = vmatmul.msk.f32.vlgmr.msra.gmra.mxu1 %vm222_vm1, %v210_v3 }
  0x80   : > { %v216_v6 = vpop.permute.xlu0 %215 }
  0x96   : > { %v248_v7 = vpop.f32.mrf.mxu0  ;;  %v268_v8 = vpop.f32.mrf.mxu1 }
  0x97   : > { %v249_v9 = vadd.f32 %v248_v7, %v216_v6  ;;  %v269_v10 = vadd.f32 %v268_v8, %v216_v6 }
  0x99   : > { %271 = vst [vmem:[%s208_s27] sm:$0xff] %v249_v9 }
  0x9a   : > { %272 = vst [vmem:[%s208_s27 + $0x8] sm:$0xff] %v269_v10 }
  0x9b PF: > { %s13_s14 = sadd.s32 1, %s425_s14   ;;  %s491_s12 = smov %s421_s13 }
  0x9c   : > { %p10_p5 = scmp.ge.s32.totalorder %s13_s14, 4   ;;  %s492_s13 = smov %s494_s15 }
  0x9e   :  { %12 = sbr.rel (!%p10_p5) target bundleno = 2 (0x2), region = 62 }

</bundles_post_ra>
